<compile_context>
chip_gen: v5e
topology: v5e:2x2
jax: 0.10.0
libtpu: 0.0.40
codegen_flags: <defaults>
</compile_context>

<pallas_src>
import functools

import jax
import jax.numpy as jnp
from jax import lax
from jax.experimental import pallas as pl
from jax.experimental.pallas import tpu as pltpu

_TILE_COLS = 1024      # lane axis (multiple of 128)
_MAX_TILE_ROWS = 256   # sublane axis cap (multiple of 8) -> 1 MiB f32 per tile
_NUM_CORE_SPLITS = 2   # leading "parallel" axis (v7x: 2 TCs; 1-TC chips just loop)


def _cdiv(a, b):
    return -(-a // b)


def _round_up(a, m):
    return _cdiv(a, m) * m


def _score_loss_kernel(o_ref, t_ref, part_ref, *, inv_k, b, n_elem,
                       tile_rows, tile_cols, tiles_per_core):
    c = pl.program_id(0)            # core-split index   ("parallel")
    i = pl.program_id(1)            # tile index per split ("arbitrary")

    @pl.when(i == 0)
    def _():
        part_ref[...] = jnp.zeros_like(part_ref)

    o = o_ref[...].astype(jnp.float32)
    t = (t_ref[...].astype(jnp.float32) - b) * inv_k     # (targets - b) / k
    d = o - t

    # Mask the padded tail by global flat element index (padding contributes 0
    # exactly, regardless of b, k or input dtype).
    tile_idx = c * tiles_per_core + i
    row = lax.broadcasted_iota(jnp.int32, (tile_rows, tile_cols), 0)
    col = lax.broadcasted_iota(jnp.int32, (tile_rows, tile_cols), 1)
    flat = (tile_idx * tile_rows + row) * tile_cols + col
    sq = jnp.where(flat < n_elem, d * d, 0.0)

    # Fold sublane row-groups with pure VPU adds into the resident (8, cols)
    # partial-sum block; the single cross-lane reduce happens in the wrapper.
    partial = sq[0:8, :]
    for g in range(1, tile_rows // 8):
        partial = partial + sq[g * 8:(g + 1) * 8, :]
    part_ref[...] += partial


def score_loss(outputs, targets, k=1.0, b=0.0, reduction="mean"):
    """Pallas equivalent of ScoreLoss(k, b, reduction).forward(outputs, targets)."""
    if reduction not in ("mean", "sum"):
        # TODO(synk): reduction='none' needs a full-shaped per-element output;
        # only 'mean' (module default) and 'sum' are implemented.
        raise NotImplementedError(f"reduction={reduction!r} not supported")

    o = jnp.squeeze(outputs)            # torch.Tensor.squeeze()
    t = targets
    assert o.shape == t.shape, (o.shape, t.shape)
    n_elem = int(o.size)

    cols = _TILE_COLS
    rows_needed = max(1, _cdiv(n_elem, cols))
    tile_rows = min(_MAX_TILE_ROWS, _round_up(rows_needed, 8))
    tiles_needed = _cdiv(rows_needed, tile_rows)
    tiles_per_core = _cdiv(tiles_needed, _NUM_CORE_SPLITS)
    num_tiles = tiles_per_core * _NUM_CORE_SPLITS
    padded_rows = num_tiles * tile_rows
    padded_n = padded_rows * cols

    # Keep native dtypes (no wrapper upcast); pad the flat tail with zeros
    # (the kernel masks it out exactly).
    o2 = jnp.pad(o.reshape(-1), (0, padded_n - n_elem)).reshape(padded_rows, cols)
    t2 = jnp.pad(t.reshape(-1), (0, padded_n - n_elem)).reshape(padded_rows, cols)

    kernel = functools.partial(
        _score_loss_kernel,
        inv_k=float(1.0 / float(k)),
        b=float(b),
        n_elem=n_elem,
        tile_rows=tile_rows,
        tile_cols=cols,
        tiles_per_core=tiles_per_core,
    )

    partials = pl.pallas_call(
        kernel,
        out_shape=jax.ShapeDtypeStruct((_NUM_CORE_SPLITS * 8, cols), jnp.float32),
        grid_spec=pltpu.PrefetchScalarGridSpec(
            num_scalar_prefetch=0,
            grid=(_NUM_CORE_SPLITS, tiles_per_core),
            in_specs=[
                pl.BlockSpec((tile_rows, cols),
                             lambda c, i: (c * tiles_per_core + i, 0)),
                pl.BlockSpec((tile_rows, cols),
                             lambda c, i: (c * tiles_per_core + i, 0)),
            ],
            out_specs=pl.BlockSpec((8, cols), lambda c, i: (c, 0)),
        ),
        compiler_params=pltpu.CompilerParams(
            dimension_semantics=("parallel", "arbitrary")),
    )(o2, t2)

    total = jnp.sum(partials)           # tiny (16, 1024) reduce, done by XLA
    if reduction == "mean":
        return total / jnp.float32(n_elem)
    return total


if __name__ == "__main__":
    key = jax.random.PRNGKey(0)
    k1, k2, k3, k4 = jax.random.split(key, 4)

    # Case 1: typical regression head — outputs (batch, 1), targets (batch,)
    batch = 8
    outputs = jax.random.normal(k1, (batch, 1), dtype=jnp.float32)
    targets = jax.random.normal(k2, (batch,), dtype=jnp.float32)
    k_param, b_param = 2.0, 0.5
    loss = score_loss(outputs, targets, k=k_param, b=b_param, reduction="mean")
    loss = jax.block_until_ready(loss)
    ref = jnp.mean((jnp.squeeze(outputs) - (targets - b_param) / k_param) ** 2)
    assert jnp.allclose(loss, ref, rtol=1e-5, atol=1e-6), (loss, ref)

    # Case 2: 4-D tensors, 'sum' reduction (exercises the tail mask).
    out4 = jax.random.normal(k3, (2, 4, 16, 16), dtype=jnp.float32)
    tgt4 = jax.random.normal(k4, (2, 4, 16, 16), dtype=jnp.float32)
    k2p, b2p = 3.0, -1.25
    loss2 = score_loss(out4, tgt4, k=k2p, b=b2p, reduction="sum")
    loss2 = jax.block_until_ready(loss2)
    ref2 = jnp.sum((jnp.squeeze(out4) - (tgt4 - b2p) / k2p) ** 2)
    assert jnp.allclose(loss2, ref2, rtol=1e-5, atol=1e-5), (loss2, ref2)

    print("KERNEL_OK")
</pallas_src>

<mosaic_0001>
module attributes {stable_mosaic.version = 11 : i64} {
  func.func @_score_loss_kernel(%arg0: i32, %arg1: i32, %arg2: memref<8x1024xf32, #tpu.memory_space<vmem>>, %arg3: memref<8x1024xf32, #tpu.memory_space<vmem>>, %arg4: memref<8x1024xf32, #tpu.memory_space<vmem>>) attributes {dimension_semantics = [#tpu.dimension_semantics<parallel>, #tpu.dimension_semantics<arbitrary>], iteration_bounds = array<i64: 2, 1>, scalar_prefetch = 0 : i64, scratch_operands = 0 : i64, tpu.core_type = #tpu.core_type<tc>, window_params = [{transform_indices = @transform_0, window_bounds = array<i64: 8, 1024>}, {transform_indices = @transform_1, window_bounds = array<i64: 8, 1024>}, {transform_indices = @transform_2, window_bounds = array<i64: 8, 1024>}]} {
    %c0_i32 = arith.constant 0 : i32
    %0 = arith.cmpi eq, %arg1, %c0_i32 : i32
    %1 = arith.extui %0 : i1 to i32
    %c0_i32_0 = arith.constant 0 : i32
    %2 = arith.cmpi ne, %1, %c0_i32_0 : i32
    scf.if %2 {
      %cst_11 = arith.constant 0.000000e+00 : f32
      %28 = vector.broadcast %cst_11 : f32 to vector<8x1024xf32>
      %c0_12 = arith.constant 0 : index
      %c0_13 = arith.constant 0 : index
      %29 = vector.load %arg4[%c0_12, %c0_13] : memref<8x1024xf32, #tpu.memory_space<vmem>>, vector<8x1024xf32>
      tpu.vector_store %arg4[%c0_12, %c0_13], %28 {strides = array<i32>} : memref<8x1024xf32, #tpu.memory_space<vmem>>, vector<8x1024xf32>,
    } else {
    }
    %c0 = arith.constant 0 : index
    %c0_1 = arith.constant 0 : index
    %3 = vector.load %arg2[%c0, %c0_1] : memref<8x1024xf32, #tpu.memory_space<vmem>>, vector<8x1024xf32>
    %c0_2 = arith.constant 0 : index
    %c0_3 = arith.constant 0 : index
    %4 = vector.load %arg3[%c0_2, %c0_3] : memref<8x1024xf32, #tpu.memory_space<vmem>>, vector<8x1024xf32>
    %cst = arith.constant 5.000000e-01 : f32
    %5 = vector.broadcast %cst : f32 to vector<8x1024xf32>
    %6 = arith.subf %4, %5 : vector<8x1024xf32>
    %cst_4 = arith.constant 5.000000e-01 : f32
    %7 = vector.broadcast %cst_4 : f32 to vector<8x1024xf32>
    %8 = arith.mulf %6, %7 : vector<8x1024xf32>
    %9 = arith.subf %3, %8 : vector<8x1024xf32>
    %c1_i32 = arith.constant 1 : i32
    %10 = arith.muli %arg0, %c1_i32 : i32
    %11 = arith.addi %10, %arg1 : i32
    %12 = tpu.iota {dimensions = array<i32: 0>} : vector<8x1024xi32>
    %13 = tpu.iota {dimensions = array<i32: 1>} : vector<8x1024xi32>
    %c8_i32 = arith.constant 8 : i32
    %14 = arith.muli %11, %c8_i32 : i32
    %15 = vector.broadcast %14 : i32 to vector<8x1024xi32>
    %16 = arith.addi %15, %12 : vector<8x1024xi32>
    %c1024_i32 = arith.constant 1024 : i32
    %17 = vector.broadcast %c1024_i32 : i32 to vector<8x1024xi32>
    %18 = arith.muli %16, %17 : vector<8x1024xi32>
    %19 = arith.addi %18, %13 : vector<8x1024xi32>
    %c8_i32_5 = arith.constant 8 : i32
    %20 = vector.broadcast %c8_i32_5 : i32 to vector<8x1024xi32>
    %21 = arith.cmpi slt, %19, %20 : vector<8x1024xi32>
    %22 = arith.mulf %9, %9 : vector<8x1024xf32>
    %cst_6 = arith.constant 0.000000e+00 : f32
    %23 = vector.broadcast %cst_6 : f32 to vector<8x1024xf32>
    %24 = arith.select %21, %22, %23 : vector<8x1024xi1>, vector<8x1024xf32>
    %c0_7 = arith.constant 0 : index
    %c0_8 = arith.constant 0 : index
    %25 = vector.load %arg4[%c0_7, %c0_8] : memref<8x1024xf32, #tpu.memory_space<vmem>>, vector<8x1024xf32>
    %26 = arith.addf %25, %24 : vector<8x1024xf32>
    %c0_9 = arith.constant 0 : index
    %c0_10 = arith.constant 0 : index
    %27 = vector.load %arg4[%c0_9, %c0_10] : memref<8x1024xf32, #tpu.memory_space<vmem>>, vector<8x1024xf32>
    tpu.vector_store %arg4[%c0_9, %c0_10], %26 {strides = array<i32>} : memref<8x1024xf32, #tpu.memory_space<vmem>>, vector<8x1024xf32>,
    return
  }
  func.func @transform_0(%arg0: i32, %arg1: i32) -> (i32, i32) {
    %c1_i32 = arith.constant 1 : i32
    %0 = arith.muli %arg0, %c1_i32 : i32
    %1 = arith.addi %0, %arg1 : i32
    %c0_i32 = arith.constant 0 : i32
    %c0_i32_0 = arith.constant 0 : i32
    return %1, %c0_i32 : i32, i32
  }
  func.func @transform_1(%arg0: i32, %arg1: i32) -> (i32, i32) {
    %c1_i32 = arith.constant 1 : i32
    %0 = arith.muli %arg0, %c1_i32 : i32
    %1 = arith.addi %0, %arg1 : i32
    %c0_i32 = arith.constant 0 : i32
    %c0_i32_0 = arith.constant 0 : i32
    return %1, %c0_i32 : i32, i32
  }
  func.func @transform_2(%arg0: i32, %arg1: i32) -> (i32, i32) {
    %c0_i32 = arith.constant 0 : i32
    %c0_i32_0 = arith.constant 0 : i32
    return %arg0, %c0_i32 : i32, i32
  }
}

</mosaic_0001>

<bundles_post_ra>
// kernel: tpu_custom_call.1
= control target key start
LH: loop header
LB: loop body
LE: loop exit
PB: predicated region body
PF: predicated region fallthrough
CT: control target
= control target key end

     0   :  { %7 = vsyncpa [#allocation3], 0  ;;  %s912_s0 = inlined_call_operand.hbm [shape: f32[16,1024], index: 0, kind: input, shape index: {}]   ;;  %s913_s1 = inlined_call_operand.hbm [shape: f32[16,1024], index: 1, kind: input, shape index: {}]   ;;  %s914_s2 = inlined_call_operand.hbm [shape: f32[16,1024], index: 2, kind: output, shape index: {}]  }
   0x1   :  { %9 = vsyncpa [#allocation3 + $0x1], 0 }
   0x2   :  { %10 = vsyncpa [#allocation6], 0 }
   0x3   :  { %12 = vsyncpa [#allocation6 + $0x1], 0 }
   0x4   :  { %13 = vsyncpa [#allocation4], 0 }
   0x5   :  { %15 = vsyncpa [#allocation4 + $0x1], 0  ;;  %s728_s9 = smov 0   ;;  %s730_s10 = smov 0  }
   0x6   :  { %s732_s11 = smov 0   ;;  %s734_s12 = smov 0  }
   0x7   :  { %s736_s13 = smov 0   ;;  %s738_s14 = smov 0  }
   0x8 LB: > { %s466_s15 = sadd.s32 4294967295, %s711_s14   ;;  %s467_s16 = sadd.s32 4294967294, %s711_s14   ;;  %s711_s14 = sphi %s738_s14, %s21_s14   ;;  %s707_s13 = sphi %s736_s13, %s923_s13   ;;  %s703_s12 = sphi %s734_s12, %s922_s12   ;;  %s699_s11 = sphi %s732_s11, %s921_s11   ;;  %s695_s10 = sphi %s730_s10, %s920_s10   ;;  %s691_s9 = sphi %s728_s9, %s919_s9  }
   0x9   : > { %s33_s17 = sadd.s32 1, %s707_s13  ;;  %s42_s18 = sadd.s32 1, %s699_s11 }
   0xa   : > { %p35_p0 = scmp.ge.s32.totalorder %s33_s17, 2  ;;  %p49_p1 = scmp.ne.s32.totalorder %s699_s11, %s695_s10 }
   0xb   : > { %p50_p2 = scmp.eq.s32.totalorder %s711_s14, 0  ;;  %p55_p3 = scmp.ne.s32.totalorder %s695_s10, %s691_s9 }
   0xc   : > { %s925_s17 = smov (%p35_p0, %s33_s17), 0  ;;  %p56_p5 = scmp.eq.s32.totalorder %s466_s15, 0 }
   0xd   : > { %p769_p4 = por %p50_p2, %p49_p1  ;;  %s39_s20 = ssub.s32 %s707_s13, %s925_s17 }
   0xe   : > { %p107_p6 = scmp.eq.s32.totalorder %s466_s15, 1  ;;  %p40_p7 = scmp.eq.s32.totalorder %s39_s20, 0 }
   0xf   : > { %p775_p8 = por %p56_p5, %p55_p3  ;;  %p113_p10 = scmp.eq.s32.totalorder %s467_s16, 1 }
  0x10   : > { %p779_p9 = por %p107_p6, %p49_p1  ;;  %p469_p12 = scmp.ge.s32.totalorder %s711_s14, 2 }
  0x11   : > { %s784_s23 = scalar_select %p40_p7, %s699_s11, %s42_s18  }
  0x12   : > { %p786_p11 = por %p113_p10, %p55_p3  ;;  %p514_p13 = scmp.lt.s32.totalorder %s711_s14, 2 }
  0x13   : > { %s133_s25 = sand.u32 1, %s699_s11   ;;  %s494_s27 = sshll.u32 %s707_s13, 6 }
  0x14   : > { %s470_s26 = sshll.u32 %s133_s25, 6  ;;  %s143_s30 = scalar_lea.hbm %s912_s0, %s494_s27 }
  0x15   : > { %s137_s3 = scalar_lea.vmem [#allocation2], %s470_s26  ;;  %s145_s5 = sshll.u32 %s143_s30, 4  ;;  %s146_s5 = int_to_ptr.hbm [resolvable:$true] %s145_s5 }
  0x16   : > { %s147_s4 = sshll.u32 %s137_s3, 4  ;;  %p504_p0 = pnand %p514_p13, %p769_p4  ;;  %s148_s4 = int_to_ptr.vmem [resolvable:$true] %s147_s4 }
  0x17   : > { %p476_p1 = scmp.ge.s32.totalorder %s711_s14, 1  ;;  %p173_p2 = scmp.lt.s32.totalorder %s711_s14, 3 }
  0x18   : > { %s134_s6 = scalar_lea.sflag [#allocation3], %s133_s25  ;;  %s164_s15 = scalar_lea.hbm %s913_s1, %s494_s27 }
  0x19   : > { %506 = dma.hbm_to_vmem [thread:$0]  (!%p504_p0), %s146_s5, 1024, %s148_s4, %s134_s6  }
  0x1a   : > { %p174_p3 = pnand %p476_p1, %p173_p2  ;;  %s158_s16 = scalar_lea.vmem [#allocation5], %s470_s26 }
  0x1b   : > { %s168_s18 = sshll.u32 %s158_s16, 4  ;;  %s166_s20 = sshll.u32 %s164_s15, 4  ;;  %s169_s18 = int_to_ptr.vmem [resolvable:$true] %s168_s18  ;;  %s167_s20 = int_to_ptr.hbm [resolvable:$true] %s166_s20 }
  0x1c   : > { %s155_s28 = scalar_lea.sflag [#allocation6], %s133_s25  ;;  %177 = sbr.rel (%p174_p3) target bundleno = 62 (0x3e), region = 28 }
  0x1d   : > { %509 = dma.hbm_to_vmem [thread:$0]  (!%p504_p0), %s167_s20, 1024, %s169_s18, %s155_s28  }
  0x1e   : > { %s805_s19 = sand.u32 (!%p174_p3), 1, %s695_s10  }
  0x1f   : > { %s808_s29 = sshll.u32 (!%p174_p3), %s805_s19, 6  ;;  %s180_s30 = scalar_lea.sflag (!%p174_p3), [#allocation3], %s805_s19 }
  0x20   : > { %s812_s3 = scalar_lea.vmem (!%p174_p3), [#allocation2], %s808_s29 }
  0x21   : > { %678 = dma.done.wait (%p775_p8), %s180_s30, 1024  }
  0x22   : > { %680 = vsyncadd (%p775_p8), %s180_s30, 4294966272  ;;  %s190_s25 = scalar_lea.sflag [#allocation6], %s805_s19  ;;  %s820_s26 = scalar_lea.vmem [#allocation5], %s808_s29 }
  0x23   : > { %682 = dma.done.wait (%p775_p8), %s190_s25, 1024  }
  0x24   : > { %684 = vsyncadd (%p775_p8), %s190_s25, 4294966272  ;;  %v275_v0 = vlaneseq  ;;  %s488_s27 = sshll.u32 %s703_s12, 3  ;;  %v242_v10 = vld [vmem:[%s820_s26] sm:$0xff]  ;;  %v243_v16 = vld [vmem:[%s820_s26 + $0x8] sm:$0xff]  ;;  %s856_s21 = scalar_lea.vmem [#allocation7], %s808_s29 }
  0x25   : > { %v287_v1 = vstv %s488_s27  ;;  %v480_v14 = vadd.f32 -0.5, %v242_v10  ;;  %v244_v18 = vld [vmem:[%s820_s26 + $0x10] sm:$0xff]  ;;  %v234_v20 = vld [vmem:[%s812_s3] sm:$0xff]  ;;  %v235_v21 = vld [vmem:[%s812_s3 + $0x8] sm:$0xff]  ;;  %v481_v22 = vadd.f32 -0.5, %v243_v16  ;;  %s496_s4 = sshll.u32 %s703_s12, 6 }
  0x26   : > { %v276_v2 = vshrl.u32 %v275_v0, 7  ;;  %v278_v3 = vand.u32 127, %v275_v0  ;;  %v482_v23 = vadd.f32 -0.5, %v244_v18  ;;  %v245_v24 = vld [vmem:[%s820_s26 + $0x18] sm:$0xff]  ;;  %v236_v28 = vld [vmem:[%s812_s3 + $0x10] sm:$0xff]  ;;  %v246_v29 = vld [vmem:[%s820_s26 + $0x20] sm:$0xff]  ;;  %s358_s7 = scalar_lea.hbm %s914_s2, %s496_s4 }
  0x27   : > { %v258_v27 = vmul.f32 0.5, %v480_v14  ;;  %v259_v30 = vmul.f32 0.5, %v481_v22  ;;  %v483_v32 = vadd.f32 -0.5, %v245_v24  ;;  %v247_v33 = vld [vmem:[%s820_s26 + $0x28] sm:$0xff]  ;;  %v237_v35 = vld [vmem:[%s812_s3 + $0x18] sm:$0xff]  ;;  %v484_v36 = vadd.f32 -0.5, %v246_v29 }
  0x28   : > { %v288_v4 = vadd.s32 %v287_v1, %v276_v2  ;;  %v279_v5 = vadd.s32 128, %v278_v3  ;;  %v280_v6 = vadd.s32 256, %v278_v3  ;;  %v281_v7 = vadd.s32 384, %v278_v3  ;;  %v248_v38 = vld [vmem:[%s820_s26 + $0x30] sm:$0xff]  ;;  %v238_v42 = vld [vmem:[%s812_s3 + $0x20] sm:$0xff]  ;;  %v239_v43 = vld [vmem:[%s812_s3 + $0x28] sm:$0xff] }
  0x29   : > { %v282_v8 = vadd.s32 512, %v278_v3  ;;  %v283_v11 = vadd.s32 640, %v278_v3  ;;  %v284_v12 = vadd.s32 768, %v278_v3  ;;  %v830_v13 = vadd.s32 896, %v278_v3  ;;  %v240_v55 = vld [vmem:[%s812_s3 + $0x30] sm:$0xff]  ;;  %v249_v57 = vld [vmem:[%s820_s26 + $0x38] sm:$0xff] }
  0x2a   : > { %v827_v9 = vmul.u32 1024, %v288_v4  ;;  %v260_v31 = vmul.f32 0.5, %v482_v23  ;;  %v266_v34 = vsub.f32 %v234_v20, %v258_v27  ;;  %v485_v37 = vadd.f32 -0.5, %v247_v33  ;;  %s360_s12 = sshll.u32 %s856_s21, 4  ;;  %s362_s8 = sshll.u32 %s358_s7, 4  ;;  %s361_s12 = int_to_ptr.vmem [resolvable:$true] %s360_s12  ;;  %s363_s8 = int_to_ptr.hbm [resolvable:$true] %s362_s8 }
  0x2b   : > { %v267_v39 = vsub.f32 %v235_v21, %v259_v30  ;;  %v261_v41 = vmul.f32 0.5, %v483_v32  ;;  %v262_v46 = vmul.f32 0.5, %v484_v36  ;;  %v486_v48 = vadd.f32 -0.5, %v248_v38  ;;  %s347_s15 = scalar_lea.sflag [#allocation4], %s805_s19  ;;  %s639_s16 = sshra.s32 %s363_s8, 4  ;;  %s640_s16 = int_to_ptr.hbm [resolvable:$true] %s639_s16 }
  0x2c   : > { %v290_v15 = vadd.s32 %v827_v9, %v278_v3  ;;  %v291_v17 = vadd.s32 %v827_v9, %v279_v5  ;;  %v292_v19 = vadd.s32 %v827_v9, %v280_v6  ;;  %v293_v25 = vadd.s32 %v827_v9, %v281_v7  ;;  %v241_v7 = vld [vmem:[%s812_s3 + $0x38] sm:$0xff]  ;;  %s641_s18 = scalar_lea.hbm %s640_s16, 64  ;;  %s645_s29 = scalar_lea.hbm %s914_s2, 128 }
  0x2d   : > { %v294_v26 = vadd.s32 %v827_v9, %v282_v8  ;;  %v268_v40 = vsub.f32 %v236_v28, %v260_v31  ;;  %v295_v44 = vadd.s32 %v827_v9, %v283_v11  ;;  %v306_v45 = vmul.f32 %v266_v34, %v266_v34  ;;  %p642_p4 = scmp.ne.s32.totalorder %s640_s16, %s641_s18  ;;  %p646_p7 = scmp.lt.s32.totalorder %s640_s16, %s914_s2 }
  0x2e   : > { %vm298_vm0 = vcmp.lt.s32.totalorder %v290_v15, 8  ;;  %vm299_vm1 = vcmp.lt.s32.totalorder %v291_v17, 8  ;;  %vm300_vm2 = vcmp.lt.s32.totalorder %v292_v19, 8  ;;  %vm301_vm3 = vcmp.lt.s32.totalorder %v293_v25, 8  ;;  %p647_p8 = scmp.lt.s32.totalorder %s645_s29, %s641_s18 }
  0x2f   : > { %vm302_vm4 = vcmp.lt.s32.totalorder %v294_v26, 8  ;;  %v263_v47 = vmul.f32 0.5, %v485_v37  ;;  %v307_v49 = vmul.f32 %v267_v39, %v267_v39  ;;  %v308_v50 = vmul.f32 %v268_v40, %v268_v40  ;;  %p643_p5 = pnand %p642_p4, %p779_p9 }
  0x30   : > { %v269_v51 = vsub.f32 %v237_v35, %v261_v41  ;;  %vm303_vm5 = vcmp.lt.s32.totalorder %v295_v44, 8  ;;  %v314_v52 = vsel %vm298_vm0, %v306_v45, 0.0  ;;  %v270_v53 = vsub.f32 %v238_v42, %v262_v46  ;;  %p648_p10 = por %p647_p8, %p646_p7 }
  0x31   : > { %v271_v54 = vsub.f32 %v239_v43, %v263_v47  ;;  %v264_v56 = vmul.f32 0.5, %v486_v48  ;;  %v315_v58 = vsel %vm299_vm1, %v307_v49, 0.0  ;;  %v316_v59 = vsel %vm300_vm2, %v308_v50, 0.0  ;;  %338 = vst [vmem:[%s856_s21] sm:$0xff] %v314_v52  ;;  %p644_p6 = pneg %p643_p5 }
  0x32   : > { %v309_v60 = vmul.f32 %v269_v51, %v269_v51  ;;  %v310_v61 = vmul.f32 %v270_v53, %v270_v53  ;;  %v296_v1 = vadd.s32 %v827_v9, %v284_v12  ;;  %v487_v2 = vadd.f32 -0.5, %v249_v57  ;;  %339 = vst [vmem:[%s856_s21 + $0x8] sm:$0xff] %v315_v58 }
  0x33   : > { %v311_v62 = vmul.f32 %v271_v54, %v271_v54  ;;  %v272_v0 = vsub.f32 %v240_v55, %v264_v56  ;;  %v297_v5 = vadd.s32 %v827_v9, %v830_v13  ;;  %340 = vst [vmem:[%s856_s21 + $0x10] sm:$0xff] %v316_v59  ;;  %p649_p13 = pnand %p648_p10, %p644_p6 }
  0x34   : > { %v317_v63 = vsel %vm301_vm3, %v309_v60, 0.0  ;;  %v318_v3 = vsel %vm302_vm4, %v310_v61, 0.0  ;;  %vm304_vm6 = vcmp.lt.s32.totalorder %v296_v1, 8  ;;  %v265_v8 = vmul.f32 0.5, %v487_v2 }
  0x35   : > { %v319_v4 = vsel %vm303_vm5, %v311_v62, 0.0  ;;  %v312_v6 = vmul.f32 %v272_v0, %v272_v0  ;;  %341 = vst [vmem:[%s856_s21 + $0x18] sm:$0xff] %v317_v63  ;;  %vm305_vm7 = vcmp.lt.s32.totalorder %v297_v5, 8 }
  0x36   : > { %342 = vst [vmem:[%s856_s21 + $0x20] sm:$0xff] %v318_v3  ;;  %v273_v11 = vsub.f32 %v241_v7, %v265_v8 }
  0x37   : > { %v320_v10 = vsel %vm304_vm6, %v312_v6, 0.0  ;;  %343 = vst [vmem:[%s856_s21 + $0x28] sm:$0xff] %v319_v4 }
  0x38   : > { %344 = vst [vmem:[%s856_s21 + $0x30] sm:$0xff] %v320_v10  ;;  %v313_v9 = vmul.f32 %v273_v11, %v273_v11 }
  0x3a   : > { %v321_v12 = vsel %vm305_vm7, %v313_v9, 0.0 }
  0x3b   : > { %345 = vst [vmem:[%s856_s21 + $0x38] sm:$0xff] %v321_v12 }
  0x3c   : > { %652 = shalt.err (!%p649_p13)
}
  0x3d   : > { %501 = dma.vmem_to_hbm [thread:$0]  (%p779_p9), %s361_s12, 1024, %s363_s8, %s347_s15  }
  0x3e PF: > { %s374_s19 = sand.u32 1, %s691_s9   ;;  %p511_p0 = pnand %p469_p12, %p786_p11 }
  0x3f   : > { %s375_s25 = scalar_lea.sflag [#allocation4], %s374_s19 }
  0x40   : > { %p512_p1 = pneg %p511_p0 }
  0x42   : > { %686 = dma.done.wait (%p512_p1), %s375_s25, 1024  }
  0x43   : > { %688 = vsyncadd (%p512_p1), %s375_s25, 4294966272  ;;  %s21_s14 = sadd.s32 1, %s711_s14   ;;  %s919_s9 = smov %s695_s10 }
  0x44   : > { %p18_p2 = scmp.ge.s32.totalorder %s21_s14, 4   ;;  %s920_s10 = smov %s699_s11 }
  0x45   : > { %s921_s11 = smov %s784_s23  ;;  %s922_s12 = smov %s707_s13 }
  0x46   : > { %s923_s13 = smov %s925_s17  ;;  %20 = sbr.rel (!%p18_p2) target bundleno = 8 (0x8), region = 90 }
  0x4b   :  { %381 = vsyncpa [#allocation3], 1 }
  0x4c   :  { %383 = vsyncpa [#allocation3 + $0x1], 1 }
  0x4d   :  { %384 = vsyncpa [#allocation6], 1 }
  0x4e   :  { %386 = vsyncpa [#allocation6 + $0x1], 1 }
  0x4f   :  { %387 = vsyncpa [#allocation4], 1 }
  0x50   :  { %389 = vsyncpa [#allocation4 + $0x1], 1 }

</bundles_post_ra>
